<compile_context>
chip_gen: v7x
topology: tpu7x:2x2x1
jax: 0.10.0
libtpu: 0.0.40
codegen_flags: <defaults>
</compile_context>

<pallas_src>
import math

import jax
import jax.numpy as jnp
from jax import lax
from jax.experimental import pallas as pl
from jax.experimental.pallas import tpu as pltpu


def _round_up(n, m):
    return ((n + m - 1) // m) * m


def _largest_divisor_leq(n, target, multiple_of=1):
    """Largest d with d | n, d <= target, d % multiple_of == 0 (or None)."""
    best = None
    d = 1
    while d * d <= n:
        if n % d == 0:
            for c in (d, n // d):
                if c <= target and c % multiple_of == 0 and (best is None or c > best):
                    best = c
        d += 1
    return best


def _vmem_capacity_bytes():
    try:
        info = pltpu.get_tpu_info()
        cap = getattr(info, "vmem_capacity_bytes", None)
        if cap:
            return int(cap)
    except Exception:
        pass
    return 64 * 1024 * 1024  # conservative default (v7x per-core VMEM)


def _make_fsmn_kernel(*, Bb, Tt, D, Lc, Rpad, Hl, lorder, rorder, lstride, rstride,
                      has_right, tiled, nt, C, io_dtype):
    """Kernel factory; all tiling parameters are static Python ints."""
    R0 = Hl + Tt                     # start of the right-context rows in the staging buffer
    n_chunks = Tt // C

    def kernel(*refs):
        i = 0
        x_ref = refs[i]; i += 1
        lh_ref = rh_ref = None
        if tiled:
            lh_ref = refs[i]; i += 1
            if has_right:
                rh_ref = refs[i]; i += 1
        c_ref = refs[i]; i += 1
        wl_ref = refs[i]; i += 1
        wr_ref = None
        if has_right:
            wr_ref = refs[i]; i += 1
        out_ref = refs[i]; i += 1
        buf = refs[i]; i += 1        # (Bb, Hl + Tt + Hr, D) persistent VMEM scratch

        t = pl.program_id(1)

        # ---- stage the Lc left-context rows (cache at the first tile, x halo otherwise) ----
        if tiled:
            @pl.when(t == 0)
            def _():
                buf[:, Hl - Lc:Hl, :] = c_ref[...]

            @pl.when(t > 0)
            def _():
                buf[:, Hl - Lc:Hl, :] = lh_ref[:, Hl - Lc:, :]
        else:
            buf[:, Hl - Lc:Hl, :] = c_ref[...]

        # ---- stage the current x tile at a sublane-aligned offset ----
        buf[:, Hl:Hl + Tt, :] = x_ref[...]

        # ---- stage the right context (next tile's head, or zeros past the end) ----
        if has_right:
            if tiled:
                @pl.when(t < nt - 1)
                def _():
                    buf[:, R0:R0 + Rpad, :] = rh_ref[:, :Rpad, :]

                @pl.when(t == nt - 1)
                def _():
                    buf[:, R0:R0 + Rpad, :] = jnp.zeros((Bb, Rpad, D), io_dtype)
            else:
                buf[:, R0:R0 + Rpad, :] = jnp.zeros((Bb, Rpad, D), io_dtype)

        # ---- hoisted per-tap weight broadcasts (chunk-sized; JAX does not CSE these) ----
        wl = wl_ref[...].astype(jnp.float32)                               # (lorder, D)
        # identity term + the shift-0 left tap (k = lorder-1) folded together
        w0_b = jnp.broadcast_to((1.0 + wl[lorder - 1]).reshape(1, 1, D), (1, C, D))
        wl_b = [jnp.broadcast_to(wl[k].reshape(1, 1, D), (1, C, D))
                for k in range(lorder - 1)]
        wr_b = []
        if has_right:
            wr = wr_ref[...].astype(jnp.float32)                           # (rorder, D)
            wr_b = [jnp.broadcast_to(wr[k].reshape(1, 1, D), (1, C, D))
                    for k in range(rorder)]

        def compute_chunk(j0):
            base = Hl + j0
            acc = buf[:, pl.ds(base, C), :].astype(jnp.float32) * w0_b
            for k in range(lorder - 1):
                s = Lc - k * lstride                                       # > 0
                # sublane-unaligned shifted slice -> per-vreg rotate (XLU), not a copy
                acc = acc + buf[:, pl.ds(base - s, C), :].astype(jnp.float32) * wl_b[k]
            if has_right:
                for k in range(rorder):
                    r = (k + 1) * rstride
                    acc = acc + buf[:, pl.ds(base + r, C), :].astype(jnp.float32) * wr_b[k]
            out_ref[:, pl.ds(j0, C), :] = acc.astype(out_ref.dtype)

        if n_chunks <= 16:
            # static unroll: full LLO scheduler visibility, live ranges bounded by the stores
            for ci in range(n_chunks):
                compute_chunk(ci * C)
        else:
            def body(ci, carry):
                j0 = ci * C
                if C % 8 == 0:
                    j0 = pl.multiple_of(j0, 8)
                compute_chunk(j0)
                return carry
            lax.fori_loop(0, n_chunks, body, 0)

    return kernel


def fsmn_block_pallas(x, cache, w_left, w_right, *, lorder, rorder, lstride=1,
                      rstride=1, batch_block=None, time_block=None, chunk_rows=None):
    """Pallas implementation of FSMNBlock.forward.

    Args:
      x:       (B, T, D)  input features.
      cache:   (B, Lc, D) left-context cache, Lc = (lorder - 1) * lstride.
      w_left:  (lorder, D) depthwise left-conv weights.
      w_right: (rorder, D) depthwise right-conv weights, or None if rorder == 0.
    Returns:
      out:       (B, T, D)
      new_cache: (B, Lc, D)   (last Lc time frames of cat(cache, x))
    """
    B, T, D = x.shape
    assert lorder is not None and lorder >= 2, "FSMN left order must be >= 2"
    assert lstride >= 1 and rstride >= 1
    Lc = (lorder - 1) * lstride
    has_right = (rorder is not None) and (rorder > 0) and (w_right is not None)
    Rpad = rorder * rstride if has_right else 0
    if cache.dtype != x.dtype:
        cache = cache.astype(x.dtype)
    assert cache.shape == (B, Lc, D), (cache.shape, (B, Lc, D))
    assert w_left.shape == (lorder, D), w_left.shape
    if has_right:
        assert w_right.shape == (rorder, D), w_right.shape
    dt = x.dtype
    itemsize = jnp.dtype(dt).itemsize

    # ---------------- tile sizing (per-generation via queried VMEM capacity) ----------------
    vmem_cap = _vmem_capacity_bytes()
    x_block_budget = max(2 << 20, vmem_cap // 8)   # x-tile target; total footprint ~5-6x this

    Hl = _round_up(Lc, 8)                          # left-halo rows (sublane aligned)
    Hr = _round_up(Rpad, 8) if has_right else 0    # right-halo rows
    align = Hl if not has_right else (Hl * Hr) // math.gcd(Hl, Hr)

    # Batch tile: a divisor of B (no batch padding); keep >= 2 batch steps when B > 1.
    if batch_block is not None:
        Bb = int(batch_block)
        assert B % Bb == 0, "batch_block must divide B"
    elif B == 1:
        Bb = 1
    else:
        row_bytes = max(1, T * D * itemsize)
        tgt = max(1, min(B // 2, x_block_budget // row_bytes))
        Bb = _largest_divisor_leq(B, tgt) or 1

    # Time tile: a divisor of T that is a multiple of the halo alignment; else a single tile.
    if time_block is not None:
        Tt = int(time_block)
        if Tt != T:
            assert T % Tt == 0, "time_block must divide T"
            assert Tt % align == 0, "time_block must be a multiple of the halo alignment"
    else:
        Tt = T
        block_bytes = Bb * T * D * itemsize
        need_capacity = block_bytes > x_block_budget
        need_parallel = (B // Bb) < 2 and block_bytes >= (256 << 10)   # >=2 steps for megacore
        if (need_capacity or need_parallel) and T >= 2 * align:
            tgt_rows = max(align, min(T // 2, x_block_budget // max(1, Bb * D * itemsize)))
            cand = _largest_divisor_leq(T, tgt_rows, multiple_of=align)
            if cand is not None:
                Tt = cand

    nt = T // Tt
    tiled = nt > 1

    # Chunk rows: the tap chain for a chunk stays in vregs; one out store per chunk.
    if chunk_rows is not None:
        C = int(chunk_rows)
        assert Tt % C == 0, "chunk_rows must divide the time block"
    elif Tt % 8 != 0:
        C = Tt
    else:
        slab_budget = 32 << 10                     # ~8 f32 vregs per chunk slab
        tgt = max(8, slab_budget // max(1, Bb * D * 4))
        C = _largest_divisor_leq(Tt, min(tgt, Tt), multiple_of=8) or Tt

    # ---------------- specs ----------------
    R_l = Tt // Hl if tiled else 1
    R_r = (Tt // Hr) if (tiled and has_right) else 1
    last_rblk = (T // Hr - 1) if (tiled and has_right) else 0

    args = [x]
    in_specs = [pl.BlockSpec((Bb, Tt, D), lambda b, t: (b, t, 0))]
    if tiled:
        args.append(x)                             # left-halo view of x (Hl rows before tile)
        in_specs.append(pl.BlockSpec(
            (Bb, Hl, D), lambda b, t: (b, jnp.maximum(t * R_l - 1, 0), 0)))
        if has_right:
            args.append(x)                         # right-halo view of x (head of next tile)
            in_specs.append(pl.BlockSpec(
                (Bb, Hr, D), lambda b, t: (b, jnp.minimum((t + 1) * R_r, last_rblk), 0)))
    args.append(cache)
    in_specs.append(pl.BlockSpec((Bb, Lc, D), lambda b, t: (b, 0, 0)))
    args.append(w_left)
    in_specs.append(pl.BlockSpec((lorder, D), lambda b, t: (0, 0)))
    if has_right:
        args.append(w_right)
        in_specs.append(pl.BlockSpec((rorder, D), lambda b, t: (0, 0)))

    out_specs = pl.BlockSpec((Bb, Tt, D), lambda b, t: (b, t, 0))
    out_shape = jax.ShapeDtypeStruct((B, T, D), dt)
    scratch_shapes = [pltpu.VMEM((Bb, Hl + Tt + Hr, D), dt)]

    # VMEM footprint estimate -> compiler limit (headroom, capped below physical capacity).
    xb = Bb * Tt * D * itemsize
    est = (4 * xb                                              # x + out, double-buffered
           + 2 * Bb * (Hl + Hr + Lc) * D * itemsize            # halo + cache blocks
           + Bb * (Hl + Tt + Hr) * D * itemsize                # staging scratch
           + (lorder + (rorder if has_right else 0) + 1) * C * D * 4   # weight broadcasts
           + 6 * Bb * C * D * 4                                # in-flight f32 chunk slabs
           + 2 * (lorder + (rorder if has_right else 0)) * D * itemsize)
    vmem_limit = int(min(int(vmem_cap * 0.9), max(est * 3 // 2, 32 << 20)))

    kernel = _make_fsmn_kernel(
        Bb=Bb, Tt=Tt, D=D, Lc=Lc, Rpad=Rpad, Hl=Hl, lorder=lorder,
        rorder=(rorder if has_right else 0), lstride=lstride, rstride=rstride,
        has_right=has_right, tiled=tiled, nt=nt, C=C, io_dtype=dt)

    out = pl.pallas_call(
        kernel,
        grid=(B // Bb, nt),
        in_specs=in_specs,
        out_specs=out_specs,
        out_shape=out_shape,
        scratch_shapes=scratch_shapes,
        compiler_params=pltpu.CompilerParams(
            # all output blocks are disjoint and there is no cross-step state,
            # so both grid axes are legal "parallel" axes (v7x megacore).
            dimension_semantics=("parallel", "parallel"),
            vmem_limit_bytes=vmem_limit),
    )(*args)

    # new cache = last Lc frames of cat(cache, x): a tiny wrapper-side slice (no big HBM copy).
    if T >= Lc:
        new_cache = x[:, T - Lc:, :]
    else:
        new_cache = jnp.concatenate([cache[:, T:, :], x], axis=1)
    return out, new_cache


def fsmn_block_ref(x, cache, w_left, w_right, *, lorder, rorder, lstride, rstride):
    """Pure-JAX reference matching the PyTorch forward semantics."""
    B, T, D = x.shape
    Lc = (lorder - 1) * lstride
    concat = jnp.concatenate([cache.astype(x.dtype), x], axis=1)         # (B, Lc+T, D)
    out = x.astype(jnp.float32)
    for k in range(lorder):
        s = k * lstride
        out = out + concat[:, s:s + T].astype(jnp.float32) * w_left[k][None, None, :]
    if rorder and rorder > 0 and w_right is not None:
        padded = jnp.concatenate(
            [x, jnp.zeros((B, rorder * rstride, D), x.dtype)], axis=1)
        for k in range(rorder):
            s = (k + 1) * rstride
            out = out + padded[:, s:s + T].astype(jnp.float32) * w_right[k][None, None, :]
    new_cache = concat[:, -Lc:, :]
    return out.astype(x.dtype), new_cache


if __name__ == "__main__":
    key = jax.random.PRNGKey(0)

    def check(B, T, D, lorder, rorder, lstride, rstride, **kw):
        Lc = (lorder - 1) * lstride
        ks = jax.random.split(jax.random.fold_in(key, B * 1000 + T), 4)
        x = jax.random.normal(ks[0], (B, T, D), dtype=jnp.float32)
        cache = jax.random.normal(ks[1], (B, Lc, D), dtype=jnp.float32)
        w_left = 0.1 * jax.random.normal(ks[2], (lorder, D), dtype=jnp.float32)
        w_right = (0.1 * jax.random.normal(ks[3], (rorder, D), dtype=jnp.float32)
                   if rorder > 0 else None)
        out, nc = fsmn_block_pallas(x, cache, w_left, w_right, lorder=lorder,
                                    rorder=rorder, lstride=lstride, rstride=rstride, **kw)
        out = jax.block_until_ready(out)
        nc = jax.block_until_ready(nc)
        out_r, nc_r = fsmn_block_ref(x, cache, w_left, w_right, lorder=lorder,
                                     rorder=rorder, lstride=lstride, rstride=rstride)
        assert out.shape == (B, T, D) and nc.shape == (B, Lc, D)
        assert jnp.allclose(out, out_r, atol=1e-5, rtol=1e-5), "output mismatch"
        assert jnp.allclose(nc, nc_r, atol=0.0, rtol=0.0), "cache mismatch"

    # 1) small module-consistent shapes: single time tile, batch grid (2 steps).
    check(B=2, T=16, D=128, lorder=4, rorder=2, lstride=1, rstride=1)
    # 2) streaming-style shape exercising halo'd time tiling (left + right halos, cache at t=0).
    check(B=1, T=192, D=128, lorder=4, rorder=2, lstride=1, rstride=1, time_block=64)
    # 3) strided left-only config (lstride>1, rorder=0), tiled.
    check(B=1, T=160, D=128, lorder=3, rorder=0, lstride=2, rstride=1, time_block=40)
    # 4) long tile exercising the rolled (fori_loop) chunk path.
    check(B=1, T=384, D=128, lorder=4, rorder=2, lstride=1, rstride=1,
          time_block=192, chunk_rows=8)

    print("KERNEL_OK")
</pallas_src>

<mosaic_0001>
module attributes {stable_mosaic.version = 11 : i64} {
  func.func @kernel(%arg0: i32, %arg1: i32, %arg2: memref<1x16x128xf32, #tpu.memory_space<vmem>>, %arg3: memref<1x3x128xf32, #tpu.memory_space<vmem>>, %arg4: memref<4x128xf32, #tpu.memory_space<vmem>>, %arg5: memref<2x128xf32, #tpu.memory_space<vmem>>, %arg6: memref<1x16x128xf32, #tpu.memory_space<vmem>>, %arg7: memref<1x32x128xf32, #tpu.memory_space<vmem>>) attributes {dimension_semantics = [#tpu.dimension_semantics<parallel>, #tpu.dimension_semantics<parallel>], iteration_bounds = array<i64: 2, 1>, scalar_prefetch = 0 : i64, scratch_operands = 1 : i64, tpu.core_type = #tpu.core_type<tc>, window_params = [{transform_indices = @transform_0, window_bounds = array<i64: 1, 16, 128>}, {transform_indices = @transform_1, window_bounds = array<i64: 1, 3, 128>}, {pipeline_mode = #tpu.pipeline_mode<synchronous>, transform_indices = @transform_2, window_bounds = array<i64: 4, 128>}, {pipeline_mode = #tpu.pipeline_mode<synchronous>, transform_indices = @transform_3, window_bounds = array<i64: 2, 128>}, {transform_indices = @transform_4, window_bounds = array<i64: 1, 16, 128>}]} {
    %c0 = arith.constant 0 : index
    %c0_0 = arith.constant 0 : index
    %c0_1 = arith.constant 0 : index
    %0 = vector.load %arg3[%c0, %c0_0, %c0_1] : memref<1x3x128xf32, #tpu.memory_space<vmem>>, vector<1x3x128xf32>
    %c0_2 = arith.constant 0 : index
    %c5 = arith.constant 5 : index
    %c0_3 = arith.constant 0 : index
    %1 = vector.load %arg7[%c0_2, %c5, %c0_3] : memref<1x32x128xf32, #tpu.memory_space<vmem>>, vector<1x3x128xf32>
    tpu.vector_store %arg7[%c0_2, %c5, %c0_3], %0 {strides = array<i32>} : memref<1x32x128xf32, #tpu.memory_space<vmem>>, vector<1x3x128xf32>,
    %c0_4 = arith.constant 0 : index
    %c0_5 = arith.constant 0 : index
    %c0_6 = arith.constant 0 : index
    %2 = vector.load %arg2[%c0_4, %c0_5, %c0_6] : memref<1x16x128xf32, #tpu.memory_space<vmem>>, vector<1x16x128xf32>
    %c0_7 = arith.constant 0 : index
    %c8 = arith.constant 8 : index
    %c0_8 = arith.constant 0 : index
    %3 = vector.load %arg7[%c0_7, %c8, %c0_8] : memref<1x32x128xf32, #tpu.memory_space<vmem>>, vector<1x16x128xf32>
    tpu.vector_store %arg7[%c0_7, %c8, %c0_8], %2 {strides = array<i32>} : memref<1x32x128xf32, #tpu.memory_space<vmem>>, vector<1x16x128xf32>,
    %cst = arith.constant 0.000000e+00 : f32
    %4 = vector.broadcast %cst : f32 to vector<1x2x128xf32>
    %c0_9 = arith.constant 0 : index
    %c24 = arith.constant 24 : index
    %c0_10 = arith.constant 0 : index
    %5 = vector.load %arg7[%c0_9, %c24, %c0_10] : memref<1x32x128xf32, #tpu.memory_space<vmem>>, vector<1x2x128xf32>
    tpu.vector_store %arg7[%c0_9, %c24, %c0_10], %4 {strides = array<i32>} : memref<1x32x128xf32, #tpu.memory_space<vmem>>, vector<1x2x128xf32>,
    %c0_11 = arith.constant 0 : index
    %c0_12 = arith.constant 0 : index
    %6 = vector.load %arg4[%c0_11, %c0_12] : memref<4x128xf32, #tpu.memory_space<vmem>>, vector<4x128xf32>
    %7 = vector.extract_strided_slice %6 {offsets = [3, 0], sizes = [1, 128], strides = [1, 1]} : vector<4x128xf32> to vector<1x128xf32>
    %8 = vector.shape_cast %7 : vector<1x128xf32> to vector<128xf32>
    %cst_13 = arith.constant 1.000000e+00 : f32
    %9 = vector.broadcast %cst_13 : f32 to vector<128xf32>
    %10 = arith.addf %9, %8 : vector<128xf32>
    %11 = vector.shape_cast %10 : vector<128xf32> to vector<1x1x128xf32>
    %12 = vector.shape_cast %11 : vector<1x1x128xf32> to vector<1x1x128xf32>
    %13 = vector.broadcast %12 : vector<1x1x128xf32> to vector<1x16x128xf32>
    %14 = vector.extract_strided_slice %6 {offsets = [0, 0], sizes = [1, 128], strides = [1, 1]} : vector<4x128xf32> to vector<1x128xf32>
    %15 = vector.shape_cast %14 : vector<1x128xf32> to vector<128xf32>
    %16 = vector.shape_cast %15 : vector<128xf32> to vector<1x1x128xf32>
    %17 = vector.shape_cast %16 : vector<1x1x128xf32> to vector<1x1x128xf32>
    %18 = vector.broadcast %17 : vector<1x1x128xf32> to vector<1x16x128xf32>
    %19 = vector.extract_strided_slice %6 {offsets = [1, 0], sizes = [1, 128], strides = [1, 1]} : vector<4x128xf32> to vector<1x128xf32>
    %20 = vector.shape_cast %19 : vector<1x128xf32> to vector<128xf32>
    %21 = vector.shape_cast %20 : vector<128xf32> to vector<1x1x128xf32>
    %22 = vector.shape_cast %21 : vector<1x1x128xf32> to vector<1x1x128xf32>
    %23 = vector.broadcast %22 : vector<1x1x128xf32> to vector<1x16x128xf32>
    %24 = vector.extract_strided_slice %6 {offsets = [2, 0], sizes = [1, 128], strides = [1, 1]} : vector<4x128xf32> to vector<1x128xf32>
    %25 = vector.shape_cast %24 : vector<1x128xf32> to vector<128xf32>
    %26 = vector.shape_cast %25 : vector<128xf32> to vector<1x1x128xf32>
    %27 = vector.shape_cast %26 : vector<1x1x128xf32> to vector<1x1x128xf32>
    %28 = vector.broadcast %27 : vector<1x1x128xf32> to vector<1x16x128xf32>
    %c0_14 = arith.constant 0 : index
    %c0_15 = arith.constant 0 : index
    %29 = vector.load %arg5[%c0_14, %c0_15] : memref<2x128xf32, #tpu.memory_space<vmem>>, vector<2x128xf32>
    %30 = vector.extract_strided_slice %29 {offsets = [0, 0], sizes = [1, 128], strides = [1, 1]} : vector<2x128xf32> to vector<1x128xf32>
    %31 = vector.shape_cast %30 : vector<1x128xf32> to vector<128xf32>
    %32 = vector.shape_cast %31 : vector<128xf32> to vector<1x1x128xf32>
    %33 = vector.shape_cast %32 : vector<1x1x128xf32> to vector<1x1x128xf32>
    %34 = vector.broadcast %33 : vector<1x1x128xf32> to vector<1x16x128xf32>
    %35 = vector.extract_strided_slice %29 {offsets = [1, 0], sizes = [1, 128], strides = [1, 1]} : vector<2x128xf32> to vector<1x128xf32>
    %36 = vector.shape_cast %35 : vector<1x128xf32> to vector<128xf32>
    %37 = vector.shape_cast %36 : vector<128xf32> to vector<1x1x128xf32>
    %38 = vector.shape_cast %37 : vector<1x1x128xf32> to vector<1x1x128xf32>
    %39 = vector.broadcast %38 : vector<1x1x128xf32> to vector<1x16x128xf32>
    %c0_16 = arith.constant 0 : index
    %c8_17 = arith.constant 8 : index
    %c0_18 = arith.constant 0 : index
    %40 = vector.load %arg7[%c0_16, %c8_17, %c0_18] : memref<1x32x128xf32, #tpu.memory_space<vmem>>, vector<1x16x128xf32>
    %41 = arith.mulf %40, %13 : vector<1x16x128xf32>
    %c0_19 = arith.constant 0 : index
    %c5_20 = arith.constant 5 : index
    %c0_21 = arith.constant 0 : index
    %42 = vector.load %arg7[%c0_19, %c5_20, %c0_21] : memref<1x32x128xf32, #tpu.memory_space<vmem>>, vector<1x16x128xf32>
    %43 = arith.mulf %42, %18 : vector<1x16x128xf32>
    %44 = arith.addf %41, %43 : vector<1x16x128xf32>
    %c0_22 = arith.constant 0 : index
    %c6 = arith.constant 6 : index
    %c0_23 = arith.constant 0 : index
    %45 = vector.load %arg7[%c0_22, %c6, %c0_23] : memref<1x32x128xf32, #tpu.memory_space<vmem>>, vector<1x16x128xf32>
    %46 = arith.mulf %45, %23 : vector<1x16x128xf32>
    %47 = arith.addf %44, %46 : vector<1x16x128xf32>
    %c0_24 = arith.constant 0 : index
    %c7 = arith.constant 7 : index
    %c0_25 = arith.constant 0 : index
    %48 = vector.load %arg7[%c0_24, %c7, %c0_25] : memref<1x32x128xf32, #tpu.memory_space<vmem>>, vector<1x16x128xf32>
    %49 = arith.mulf %48, %28 : vector<1x16x128xf32>
    %50 = arith.addf %47, %49 : vector<1x16x128xf32>
    %c0_26 = arith.constant 0 : index
    %c9 = arith.constant 9 : index
    %c0_27 = arith.constant 0 : index
    %51 = vector.load %arg7[%c0_26, %c9, %c0_27] : memref<1x32x128xf32, #tpu.memory_space<vmem>>, vector<1x16x128xf32>
    %52 = arith.mulf %51, %34 : vector<1x16x128xf32>
    %53 = arith.addf %50, %52 : vector<1x16x128xf32>
    %c0_28 = arith.constant 0 : index
    %c10 = arith.constant 10 : index
    %c0_29 = arith.constant 0 : index
    %54 = vector.load %arg7[%c0_28, %c10, %c0_29] : memref<1x32x128xf32, #tpu.memory_space<vmem>>, vector<1x16x128xf32>
    %55 = arith.mulf %54, %39 : vector<1x16x128xf32>
    %56 = arith.addf %53, %55 : vector<1x16x128xf32>
    %c0_30 = arith.constant 0 : index
    %c0_31 = arith.constant 0 : index
    %c0_32 = arith.constant 0 : index
    %57 = vector.load %arg6[%c0_30, %c0_31, %c0_32] : memref<1x16x128xf32, #tpu.memory_space<vmem>>, vector<1x16x128xf32>
    tpu.vector_store %arg6[%c0_30, %c0_31, %c0_32], %56 {strides = array<i32>} : memref<1x16x128xf32, #tpu.memory_space<vmem>>, vector<1x16x128xf32>,
    return
  }
  func.func @transform_0(%arg0: i32, %arg1: i32) -> (i32, i32, i32) {
    %c0_i32 = arith.constant 0 : i32
    %c0_i32_0 = arith.constant 0 : i32
    return %arg0, %arg1, %c0_i32 : i32, i32, i32
  }
  func.func @transform_1(%arg0: i32, %arg1: i32) -> (i32, i32, i32) {
    %c0_i32 = arith.constant 0 : i32
    %c0_i32_0 = arith.constant 0 : i32
    %c0_i32_1 = arith.constant 0 : i32
    return %arg0, %c0_i32, %c0_i32_0 : i32, i32, i32
  }
  func.func @transform_2(%arg0: i32, %arg1: i32) -> (i32, i32) {
    %c0_i32 = arith.constant 0 : i32
    %c0_i32_0 = arith.constant 0 : i32
    %c0_i32_1 = arith.constant 0 : i32
    return %c0_i32, %c0_i32_0 : i32, i32
  }
  func.func @transform_3(%arg0: i32, %arg1: i32) -> (i32, i32) {
    %c0_i32 = arith.constant 0 : i32
    %c0_i32_0 = arith.constant 0 : i32
    %c0_i32_1 = arith.constant 0 : i32
    return %c0_i32, %c0_i32_0 : i32, i32
  }
  func.func @transform_4(%arg0: i32, %arg1: i32) -> (i32, i32, i32) {
    %c0_i32 = arith.constant 0 : i32
    %c0_i32_0 = arith.constant 0 : i32
    return %arg0, %arg1, %c0_i32 : i32, i32, i32
  }
}

</mosaic_0001>

<bundles_post_ra>
// kernel: tpu_custom_call.1
= control target key start
LH: loop header
LB: loop body
LE: loop exit
PB: predicated region body
PF: predicated region fallthrough
CT: control target
= control target key end

     0   :  { %9 = vsyncpa [#allocation4], 0  ;;  %s859_s0 = inlined_call_operand.hbm [shape: f32[2,16,128], index: 0, kind: input, shape index: {}]   ;;  %s860_s1 = inlined_call_operand.vmem [shape: f32[2,3,128], index: 1, kind: input, shape index: {}]   ;;  %s861_s2 = inlined_call_operand.vmem [shape: f32[4,128], index: 2, kind: input, shape index: {}]   ;;  %s862_s3 = inlined_call_operand.vmem [shape: f32[2,128], index: 3, kind: input, shape index: {}]   ;;  %s863_s4 = inlined_call_operand.hbm [shape: f32[2,16,128], index: 4, kind: output, shape index: {}]  }
   0x1   :  { %11 = vsyncpa [#allocation4 + $0x1], 0 }
   0x2   :  { %12 = vsyncpa [#allocation5], 0 }
   0x3   :  { %14 = vsyncpa [#allocation5 + $0x1], 0  ;;  %s669_s15 = smov 0   ;;  %s671_s16 = smov 0  }
   0x4   :  { %s673_s17 = smov 0   ;;  %s675_s18 = smov 0  }
   0x5   :  { %s677_s19 = smov 0   ;;  %s679_s20 = smov 0  }
   0x6 LB: > { %s438_s21 = sadd.s32 4294967295, %s635_s20   ;;  %s439_s22 = sadd.s32 4294967294, %s635_s20   ;;  %s635_s20 = sphi %s679_s20, %s20_s20   ;;  %s631_s19 = sphi %s677_s19, %s878_s19   ;;  %s627_s18 = sphi %s675_s18, %s877_s18   ;;  %s623_s17 = sphi %s673_s17, %s876_s17   ;;  %s619_s16 = sphi %s671_s16, %s875_s16   ;;  %s615_s15 = sphi %s669_s15, %s874_s15  }
   0x7   : > { %s32_s23 = sadd.s32 1, %s631_s19  ;;  %s41_s24 = sadd.s32 1, %s623_s17 }
   0x8   : > { %p34_p0 = scmp.ge.s32.totalorder %s32_s23, 2  ;;  %p48_p1 = scmp.ne.s32.totalorder %s623_s17, %s619_s16 }
   0x9   : > { %p49_p2 = scmp.eq.s32.totalorder %s635_s20, 0  ;;  %p54_p3 = scmp.ne.s32.totalorder %s619_s16, %s615_s15 }
   0xa   : > { %s880_s23 = smov (%p34_p0, %s32_s23), 0  ;;  %p55_p5 = scmp.eq.s32.totalorder %s438_s21, 0 }
   0xb   : > { %p710_p4 = por %p49_p2, %p48_p1  ;;  %s36_s26 = ssub.s32 %s631_s19, %s880_s23 }
   0xc   : > { %p148_p6 = scmp.eq.s32.totalorder %s438_s21, 1  ;;  %p39_p7 = scmp.eq.s32.totalorder %s36_s26, 0 }
   0xd   : > { %p716_p8 = por %p55_p5, %p54_p3  ;;  %p154_p10 = scmp.eq.s32.totalorder %s439_s22, 1 }
   0xe   : > { %p720_p9 = por %p148_p6, %p48_p1  ;;  %p468_p13 = scmp.lt.s32.totalorder %s635_s20, 2 }
   0xf   : > { %s725_s29 = scalar_select %p39_p7, %s623_s17, %s41_s24  }
  0x10   : > { %s867_s28 = scalar_select %p720_p9, 1, 0 }
  0x11   : > { %p727_p11 = por %p154_p10, %p54_p3  ;;  %s180_s5 = sand.u32 1, %s623_s17  }
  0x12   : > { %s442_s6 = sshll.u32 %s180_s5, 4  ;;  %s454_s7 = sshll.u32 %s631_s19, 8 }
  0x13   : > { %s868_s30 = scalar_select %p727_p11, 1, 0 }
  0x14   : > { %s738_s10 = scalar_lea.hbm %s859_s0, %s454_s7  ;;  %s184_s11 = scalar_lea.vmem [#allocation3], %s442_s6 }
  0x15   : > { %s193_s12 = sshll.u32 %s184_s11, 4  ;;  %p744_p0 = pnand %p468_p13, %p710_p4  ;;  %s740_s12 = int_to_ptr.vmem [resolvable:$true] %s193_s12 }
  0x16   : > { %s749_s14 = scalar_lea.sflag [#allocation4], %s180_s5  ;;  %s523_s21 = scalar_lea.hbm %s738_s10, 256 }
  0x17   : > { %p524_p2 = scmp.ne.s32.totalorder %s738_s10, %s523_s21  ;;  %p525_p3 = pneg %p744_p0 }
  0x18   : > { %s528_s25 = scalar_lea.hbm %s859_s0, 512  ;;  %p529_p4 = scmp.lt.u32.totalorder %s738_s10, %s859_s0 }
  0x19   : > { %p526_p5 = pnand %p525_p3, %p524_p2  ;;  %p530_p7 = scmp.lt.u32.totalorder %s528_s25, %s523_s21 }
  0x1a   : > { %p532_p13 = scmp.lt.u32.totalorder %s523_s21, %s738_s10 }
  0x1b   : > { %p527_p6 = pneg %p526_p5  ;;  %p531_p10 = por %p530_p7, %p529_p4 }
  0x1d   : > { %p533_p12 = por %p532_p13, %p531_p10 }
  0x1f   : > { %p534_p1 = pnand %p533_p12, %p527_p6 }
  0x21   : > { %537 = shalt.err (!%p534_p1)
}
  0x22   : > { %s538_s5 = scalar_lea.vmem %s740_s12, 256  ;;  %s637_s7 = smov [#allocation3]  }
  0x23   : > { %p539_p2 = scmp.ne.s32.totalorder %s740_s12, %s538_s5  ;;  %s543_s8 = sshll.u32 %s637_s7, 4  ;;  %s544_s8 = int_to_ptr.vmem [resolvable:$false] %s543_s8 }
  0x24   : > { %s545_s9 = scalar_lea.vmem %s544_s8, 512  ;;  %p546_p9 = scmp.lt.s32.totalorder %s740_s12, %s544_s8 }
  0x25   : > { %p541_p5 = pnand %p539_p2, %p525_p3  ;;  %p547_p4 = scmp.lt.s32.totalorder %s545_s9, %s538_s5 }
  0x27   : > { %p542_p11 = pneg %p541_p5  ;;  %p548_p7 = por %p547_p4, %p546_p9 }
  0x29   : > { %p549_p10 = pnand %p548_p7, %p542_p11 }
  0x2b   : > { %552 = shalt.err (!%p549_p10)
}
  0x2c   : > { %s638_s11 = smov 128   ;;  %s639_s21 = smov 8  }
  0x2d   : > { %463 = dma.hbm_to_vmem [thread:$0]  (!%p744_p0), %s738_s10, 256, %s740_s12, %s749_s14, %s638_s11, %s638_s11, %s639_s21  }
  0x2e   : > { %p208_p12 = scmp.lt.s32.totalorder %s635_s20, 3  ;;  %p870_p1 = scmp.ge.s32.totalorder %s635_s20, 1 }
  0x30   : > { %p209_p3 = pnand %p870_p1, %p208_p12 }
  0x31   : > { %s781_s22 = sand.u32 (!%p209_p3), 1, %s619_s16  }
  0x32   : > { %212 = sbr.rel (%p209_p3) target bundleno = 100 (0x64), region = 36  ;;  %s446_s24 = sshll.u32 (!%p209_p3), %s781_s22, 4 }
  0x33   : > { %s215_s25 = scalar_lea.sflag (!%p209_p3), [#allocation4], %s781_s22  ;;  %s218_s26 = scalar_lea.vmem (!%p209_p3), [#allocation3], %s446_s24 }
  0x39   : > { %606 = dma.done.wait (%p716_p8), %s215_s25, 256  }
  0x3a   : > { %608 = vsyncadd (%p716_p8), %s215_s25, 4294967040  ;;  %p248_p9 = scmp.lt.s32.totalorder %s627_s18, 1  ;;  %v262_v0 = vlaneseq  ;;  %v640_v1 = vmov 0.0   ;;  %v255_v4 = vld [vmem:[%s218_s26] sm:$0xff]  ;;  %v256_v5 = vld [vmem:[%s218_s26 + $0x8] sm:$0xff]  ;;  %s246_s9 = scalar_lea.vmem [#allocation6], %s446_s24 }
  0x3b   : > { %259 = vst [vmem:[#allocation2 + $0x18] sm:$0x3] %v640_v1  ;;  %257 = vst [vmem:[#allocation2 + $0x8] sm:$0xff] %v255_v4  ;;  %v260_v7 = vld [vmem:[%s861_s2] sm:$0xf]  ;;  %s339_s11 = sshll.u32 %s246_s9, 4  ;;  %s805_s11 = int_to_ptr.vmem [resolvable:$true] %s339_s11 }
  0x3c   : > { %s249_s10 = scalar_select %p248_p9, %s627_s18, 1  ;;  %v263_v2 = vshrl.u32 %v262_v0, 7  ;;  %258 = vst [vmem:[#allocation2 + $0x10] sm:$0xff] %v256_v5  ;;  %v261_v9 = vadd.f32 1.0, %v260_v7  ;;  %v278_v16 = vld [vmem:[%s862_s3] sm:$0x3] }
  0x3d   : > { %s455_s21 = sshll.u32 %s627_s18, 8  ;;  %s324_s24 = scalar_lea.sflag [#allocation5], %s781_s22 }
  0x3e   : > { %s448_s12 = sshll.u32 %s249_s10, 2  ;;  %v264_v6 = vsub.s32 3, %v263_v2  ;;  %v268_v8 = vsub.s32 0, %v263_v2  ;;  %v272_v10 = vsub.s32 1, %v263_v2  ;;  %v276_v13 = vsub.s32 2, %v263_v2  ;;  %s810_s10 = scalar_lea.hbm %s863_s4, %s455_s21 }
  0x3f   : > { %s251_s6 = scalar_lea.vmem %s860_s1, %s448_s12  ;;  %s553_s18 = scalar_lea.vmem %s805_s11, 256 }
  0x40   : > { %v253_v3 = vld [vmem:[%s251_s6] sm:$0x7]  ;;  %v265_v11 = vrot.slane %v261_v9, %v264_v6  ;;  %v269_v12 = vrot.slane %v260_v7, %v268_v8  ;;  %v273_v14 = vrot.slane %v260_v7, %v272_v10  ;;  %v277_v20 = vrot.slane %v260_v7, %v276_v13  ;;  %p554_p8 = scmp.ne.s32.totalorder %s805_s11, %s553_s18  ;;  %p871_p11 = scmp.ne.s32.totalorder %s867_s28, 0 }
  0x41   : > { %254 = vst [vmem:[#allocation2 + $0x5] sm:$0x7] %v253_v3  ;;  %v282_v26 = vrot.slane %v278_v16, %v268_v8  ;;  %v286_v33 = vrot.slane %v278_v16, %v272_v10  ;;  %s641_s12 = smov [#allocation6]  }
  0x42   : > { %v289_v15 = vmul.f32 %v265_v11, %v255_v4  ;;  %v290_v19 = vmul.f32 %v265_v11, %v256_v5  ;;  %p555_p0 = pnand %p554_p8, %p871_p11  ;;  %s557_s13 = sshll.u32 %s641_s12, 4  ;;  %s558_s13 = int_to_ptr.vmem [resolvable:$false] %s557_s13 }
  0x43   : > { %v292_v22 = vld [vmem:[#allocation2 + $0xd] sm:$0xff]  ;;  %s559_s14 = scalar_lea.vmem %s558_s13, 512  ;;  %p560_p13 = scmp.lt.s32.totalorder %s805_s11, %s558_s13 }
  0x44   : > { %v294_v24 = vmul.f32 %v292_v22, %v269_v12  ;;  %v298_v25 = vld [vmem:[#allocation2 + $0xe] sm:$0xff]  ;;  %p556_p6 = pneg %p555_p0  ;;  %p561_p2 = scmp.lt.s32.totalorder %s559_s14, %s553_s18 }
  0x45   : > { %v304_v29 = vld [vmem:[#allocation2 + $0xf] sm:$0xff]  ;;  %v300_v32 = vmul.f32 %v298_v25, %v273_v14 }
  0x46   : > { %v309_v30 = vld [vmem:[#allocation2 + $0x9] sm:$0xff]  ;;  %v296_v31 = vadd.f32 %v294_v24, %v290_v19  ;;  %v310_v36 = vld [vmem:[#allocation2 + $0x11] sm:$0xff]  ;;  %v306_v39 = vmul.f32 %v304_v29, %v277_v20  ;;  %p562_p5 = por %p561_p2, %p560_p13 }
  0x47   : > { %v315_v37 = vld [vmem:[#allocation2 + $0xa] sm:$0xff]  ;;  %v311_v41 = vmul.f32 %v309_v30, %v282_v26  ;;  %v316_v42 = vld [vmem:[#allocation2 + $0x12] sm:$0xff]  ;;  %v312_v44 = vmul.f32 %v310_v36, %v282_v26 }
  0x48   : > { %v291_v17 = vld [vmem:[#allocation2 + $0x5] sm:$0xff]  ;;  %v302_v38 = vadd.f32 %v300_v32, %v296_v31  ;;  %v317_v46 = vmul.f32 %v315_v37, %v286_v33  ;;  %v318_v48 = vmul.f32 %v316_v42, %v286_v33  ;;  %p563_p4 = pnand %p562_p5, %p556_p6 }
  0x49   : > { %v297_v18 = vld [vmem:[#allocation2 + $0x6] sm:$0xff]  ;;  %v293_v21 = vmul.f32 %v291_v17, %v269_v12 }
  0x4a   : > { %v303_v23 = vld [vmem:[#allocation2 + $0x7] sm:$0xff]  ;;  %v299_v28 = vmul.f32 %v297_v18, %v273_v14  ;;  %v308_v43 = vadd.f32 %v306_v39, %v302_v38 }
  0x4b   : > { %v295_v27 = vadd.f32 %v293_v21, %v289_v15  ;;  %v305_v35 = vmul.f32 %v303_v23, %v277_v20 }
  0x4c   : > { %v314_v47 = vadd.f32 %v312_v44, %v308_v43 }
  0x4d   : > { %v301_v34 = vadd.f32 %v299_v28, %v295_v27 }
  0x4e   : > { %v320_v50 = vadd.f32 %v318_v48, %v314_v47 }
  0x4f   : > { %v307_v40 = vadd.f32 %v305_v35, %v301_v34 }
  0x50   : > { %322 = vst [vmem:[%s246_s9 + $0x8] sm:$0xff] %v320_v50 }
  0x51   : > { %v313_v45 = vadd.f32 %v311_v41, %v307_v40 }
  0x53   : > { %v319_v49 = vadd.f32 %v317_v46, %v313_v45 }
  0x55   : > { %321 = vst [vmem:[%s246_s9] sm:$0xff] %v319_v49 }
  0x56   : > { %566 = shalt.err (!%p563_p4)
}
  0x57   : > { %s567_s6 = scalar_lea.hbm %s810_s10, 256  ;;  %s571_s7 = scalar_lea.hbm %s863_s4, 512 }
  0x58   : > { %p568_p7 = scmp.ne.s32.totalorder %s810_s10, %s567_s6  ;;  %p572_p1 = scmp.lt.u32.totalorder %s810_s10, %s863_s4 }
  0x59   : > { %p573_p3 = scmp.lt.u32.totalorder %s571_s7, %s567_s6  ;;  %p575_p8 = scmp.lt.u32.totalorder %s567_s6, %s810_s10 }
  0x5a   : > { %p569_p10 = pnand %p568_p7, %p871_p11 }
  0x5b   : > { %p574_p9 = por %p573_p3, %p572_p1 }
  0x5c   : > { %p570_p12 = pneg %p569_p10 }
  0x5d   : > { %p576_p0 = por %p575_p8, %p574_p9 }
  0x5f   : > { %p577_p6 = pnand %p576_p0, %p570_p12 }
  0x61   : > { %580 = shalt.err (!%p577_p6)
}
  0x62   : > { %s642_s21 = smov 128   ;;  %s643_s25 = smov 8  }
  0x63   : > { %458 = dma.vmem_to_hbm [thread:$0]  (%p871_p11), %s805_s11, 256, %s810_s10, %s324_s24, %s642_s21, %s642_s21, %s643_s25  }
  0x64 PF: > { %s354_s26 = sand.u32 1, %s615_s15   ;;  %p872_p13 = scmp.ne.s32.totalorder %s868_s30, 0 }
  0x65   : > { %p873_p2 = scmp.ge.s32.totalorder %s635_s20, 2  ;;  %s355_s18 = scalar_lea.sflag [#allocation5], %s354_s26 }
  0x67   : > { %p465_p5 = pnand %p873_p2, %p872_p13 }
  0x69   : > { %610 = dma.done.wait (!%p465_p5), %s355_s18, 256  }
  0x6a   : > { %612 = vsyncadd (!%p465_p5), %s355_s18, 4294967040  ;;  %s20_s20 = sadd.s32 1, %s635_s20   ;;  %s874_s15 = smov %s619_s16 }
  0x6b   : > { %p17_p4 = scmp.ge.s32.totalorder %s20_s20, 4   ;;  %s875_s16 = smov %s623_s17 }
  0x6c   : > { %s876_s17 = smov %s725_s29  ;;  %s877_s18 = smov %s631_s19 }
  0x6d   : > { %s878_s19 = smov %s880_s23  ;;  %19 = sbr.rel (!%p17_p4) target bundleno = 6 (0x6), region = 84 }
  0x74   :  { %360 = vsyncpa [#allocation4], 1 }
  0x75   :  { %362 = vsyncpa [#allocation4 + $0x1], 1 }
  0x76   :  { %363 = vsyncpa [#allocation5], 1 }
  0x77   :  { %365 = vsyncpa [#allocation5 + $0x1], 1 }

</bundles_post_ra>
